<compile_context>
chip_gen: v7x
topology: tpu7x:2x2x1
jax: 0.10.0
libtpu: 0.0.40
codegen_flags: <defaults>
</compile_context>

<pallas_src>
import functools

import numpy as np

import jax
import jax.numpy as jnp
from jax import lax
from jax.experimental import pallas as pl
from jax.experimental.pallas import tpu as pltpu


def _soft_entropy_kernel(x_ref, t_ref, vec_ref, tsum_ref, *, n_rows):
    x = x_ref[...].astype(jnp.float32)   # student logits  (TN, C)
    t = t_ref[...].astype(jnp.float32)   # teacher logits  (TN, C), detached

    # log_softmax(inputs) along the class (lane) axis.
    x_max = jnp.max(x, axis=-1, keepdims=True)
    x_shift = x - x_max
    lse = jnp.log(jnp.sum(jnp.exp(x_shift), axis=-1, keepdims=True))
    log_probs = x_shift - lse

    # softmax(targets) along the class (lane) axis.
    t_max = jnp.max(t, axis=-1, keepdims=True)
    t_exp = jnp.exp(t - t_max)
    t_sum = jnp.sum(t_exp, axis=-1, keepdims=True)
    p_t = t_exp * pl.reciprocal(t_sum, approx=False)

    # Element-wise soft cross-entropy vector (cast only on the way out).
    vec = -p_t * log_probs
    vec_ref[...] = vec.astype(vec_ref.dtype)

    # Per-tile f32 partial sum.  Mask rows past N (ragged last tile): padded
    # rows are undefined and may be Inf/NaN after exp, so *select* them away
    # (jnp.where, not a multiply) before reducing.
    tn = x.shape[0]
    row_ids = pl.program_id(0) * tn + lax.broadcasted_iota(jnp.int32, (tn, 1), 0)
    row_sums = jnp.sum(vec, axis=-1, keepdims=True)              # (TN, 1) f32
    row_sums = jnp.where(row_ids < n_rows, row_sums, 0.0)
    tile_total = jnp.sum(row_sums)                                # scalar f32

    # Lane-dense splat of the tile scalar: unmasked (8,128) stores + dense DMA
    # instead of a last-dim-1 masked-vst output.  Wrapper reads [:, 0, 0].
    tsum_ref[...] = jnp.broadcast_to(tile_total, tsum_ref.shape).astype(jnp.float32)


def soft_entropy_loss(inputs, targets, *, block_rows=None, vec_dtype=None):
    """Forward pass of SoftEntropyLoss.

    inputs, targets: [N, C] logits (any float dtype; compute is always f32).
    vec_dtype: dtype of the returned loss_vec.  Defaults to inputs.dtype, i.e.
      bf16 inputs give a bf16 loss_vec (cuts HBM writeback traffic); the scalar
      loss is always reduced in f32 before that cast.  Pass jnp.float32
      explicitly if an f32 loss_vec is required.
    Returns (scalar loss, [N, C] loss_vec), matching SoftEntropyLoss.forward.
    """
    assert inputs.shape == targets.shape
    N, C = inputs.shape
    if vec_dtype is None:
        vec_dtype = inputs.dtype

    in_b = np.dtype(inputs.dtype).itemsize
    tgt_b = np.dtype(targets.dtype).itemsize
    vec_b = np.dtype(vec_dtype).itemsize

    # Generation-aware scoped-VMEM limit: ~5/8 of physical VMEM, capped.
    #   v7x (64 MiB physical, per TC)  -> 40 MiB
    #   v5e/v6e (128 MiB physical)     -> 80 MiB
    try:
        phys_vmem = int(pltpu.get_tpu_info().vmem_capacity_bytes)
    except Exception:
        phys_vmem = 64 * 1024 * 1024   # conservative fallback: v7x per-TC VMEM
    vmem_limit = int(min((phys_vmem * 5) // 8, 96 * 1024 * 1024))

    if block_rows is None:
        # dtype-aware per-row working set:
        #   2 input blocks + 1 output block, each double-buffered by the
        #   pipeline, at their real itemsizes, plus ~6 internal (TN, C) f32
        #   temporaries (f32 upcasts of x/t, log_probs, t_exp, p_t, vec).
        bytes_per_row = C * (2 * (in_b + tgt_b) + 2 * vec_b + 6 * 4)
        budget = (vmem_limit * 4) // 5          # headroom for compiler scratch
        tn = budget // bytes_per_row
        tn = max(8, min(4096, (tn // 8) * 8))   # sublane-aligned, generous cap
        block_rows = min(tn, ((N + 7) // 8) * 8)   # never bigger than the batch
    TN = int(block_rows)
    assert TN % 8 == 0, "block_rows must be a multiple of 8 (sublane tiling)"

    num_tiles = pl.cdiv(N, TN)

    cost = pl.CostEstimate(
        flops=10 * N * C,
        transcendentals=2 * N * C,                           # 2 exp (+1 log/row)
        bytes_accessed=N * C * (in_b + tgt_b + vec_b) + num_tiles * 8 * 128 * 4,
    )

    kernel = functools.partial(_soft_entropy_kernel, n_rows=N)

    loss_vec, tile_sums = pl.pallas_call(
        kernel,
        out_shape=(
            jax.ShapeDtypeStruct((N, C), vec_dtype),
            jax.ShapeDtypeStruct((num_tiles, 8, 128), jnp.float32),
        ),
        grid=(num_tiles,),
        in_specs=[
            pl.BlockSpec((TN, C), lambda i: (i, 0)),
            pl.BlockSpec((TN, C), lambda i: (i, 0)),
        ],
        out_specs=(
            pl.BlockSpec((TN, C), lambda i: (i, 0)),
            pl.BlockSpec((1, 8, 128), lambda i: (i, 0, 0)),
        ),
        compiler_params=pltpu.CompilerParams(
            dimension_semantics=("parallel",),   # both TCs on v7x; no-op elsewhere
            vmem_limit_bytes=vmem_limit,
        ),
        cost_estimate=cost,
    )(inputs, targets)

    # loss = loss_vec.mean(0).sum() == sum(loss_vec) / N, from f32 partial sums.
    loss = jnp.sum(tile_sums[:, 0, 0]) / N
    return loss, loss_vec


def _reference(inputs, targets):
    # Pure-JAX reference mirroring the PyTorch module exactly (f32 compute).
    log_probs = jax.nn.log_softmax(inputs.astype(jnp.float32), axis=1)
    p_t = jax.nn.softmax(targets.astype(jnp.float32), axis=1)
    loss_vec = -p_t * log_probs
    loss = jnp.sum(jnp.mean(loss_vec, axis=0))
    return loss, loss_vec


if __name__ == "__main__":
    key = jax.random.PRNGKey(0)
    k1, k2, k3, k4 = jax.random.split(key, 4)

    # --- main demo: small tile-aligned shapes, auto tile sizing --------------
    N, C = 16, 128
    inputs = jax.random.normal(k1, (N, C), dtype=jnp.float32)    # results['prob']
    targets = jax.random.normal(k2, (N, C), dtype=jnp.float32)   # results_mean['prob']

    loss, loss_vec = soft_entropy_loss(inputs, targets)
    jax.block_until_ready((loss, loss_vec))
    ref_loss, ref_vec = _reference(inputs, targets)
    assert jnp.allclose(loss, ref_loss, atol=1e-4, rtol=1e-4)
    assert jnp.allclose(loss_vec, ref_vec, atol=1e-4, rtol=1e-4)

    # --- forced multi-tile grid (exercises the batch-tiling path) ------------
    loss2, vec2 = soft_entropy_loss(inputs, targets, block_rows=8)
    jax.block_until_ready((loss2, vec2))
    assert jnp.allclose(loss2, ref_loss, atol=1e-4, rtol=1e-4)
    assert jnp.allclose(vec2, ref_vec, atol=1e-4, rtol=1e-4)

    # --- ragged last tile (N % block_rows != 0) + non-128-multiple C ---------
    Nr, Cr = 13, 100
    xr = jax.random.normal(k3, (Nr, Cr), dtype=jnp.float32)
    tr = jax.random.normal(k4, (Nr, Cr), dtype=jnp.float32)
    loss3, vec3 = soft_entropy_loss(xr, tr, block_rows=8)
    jax.block_until_ready((loss3, vec3))
    ref_loss3, ref_vec3 = _reference(xr, tr)
    assert jnp.allclose(loss3, ref_loss3, atol=1e-4, rtol=1e-4)
    assert jnp.allclose(vec3, ref_vec3, atol=1e-4, rtol=1e-4)

    # --- bf16 I/O: loss_vec defaults to bf16 (documented caller choice);
    #     the scalar loss remains f32-accurate (row sums taken before cast). ---
    xb = inputs.astype(jnp.bfloat16)
    tb = targets.astype(jnp.bfloat16)
    loss4, vec4 = soft_entropy_loss(xb, tb)
    jax.block_until_ready((loss4, vec4))
    ref_loss4, ref_vec4 = _reference(xb, tb)
    assert vec4.dtype == jnp.bfloat16
    assert jnp.allclose(loss4, ref_loss4, atol=1e-3, rtol=1e-3)
    assert jnp.allclose(vec4.astype(jnp.float32), ref_vec4, atol=3e-2, rtol=3e-2)

    print("KERNEL_OK")
</pallas_src>

<mosaic_0001>
module attributes {stable_mosaic.version = 11 : i64} {
  func.func @_soft_entropy_kernel(%arg0: i32, %arg1: memref<16x128xf32, #tpu.memory_space<vmem>>, %arg2: memref<16x128xf32, #tpu.memory_space<vmem>>, %arg3: memref<16x128xf32, #tpu.memory_space<vmem>>, %arg4: memref<1x8x128xf32, #tpu.memory_space<vmem>>) attributes {dimension_semantics = [#tpu.dimension_semantics<parallel>], iteration_bounds = array<i64: 1>, scalar_prefetch = 0 : i64, scratch_operands = 0 : i64, tpu.core_type = #tpu.core_type<tc>, window_params = [{transform_indices = @transform_0, window_bounds = array<i64: 16, 128>}, {transform_indices = @transform_1, window_bounds = array<i64: 16, 128>}, {transform_indices = @transform_2, window_bounds = array<i64: 16, 128>}, {transform_indices = @transform_3, window_bounds = array<i64: 1, 8, 128>}]} {
    %c0 = arith.constant 0 : index
    %c0_0 = arith.constant 0 : index
    %0 = vector.load %arg1[%c0, %c0_0] : memref<16x128xf32, #tpu.memory_space<vmem>>, vector<16x128xf32>
    %c0_1 = arith.constant 0 : index
    %c0_2 = arith.constant 0 : index
    %1 = vector.load %arg2[%c0_1, %c0_2] : memref<16x128xf32, #tpu.memory_space<vmem>>, vector<16x128xf32>
    %cst = arith.constant dense<0xFF800000> : vector<16xf32>
    %2 = vector.multi_reduction <maximumf>, %0, %cst [1] : vector<16x128xf32> to vector<16xf32>
    %3 = vector.shape_cast %2 : vector<16xf32> to vector<16x1xf32>
    %4 = vector.broadcast %3 : vector<16x1xf32> to vector<16x128xf32>
    %5 = arith.subf %0, %4 : vector<16x128xf32>
    %6 = math.exp %5 : vector<16x128xf32>
    %cst_3 = arith.constant dense<0.000000e+00> : vector<16xf32>
    %7 = vector.multi_reduction <add>, %6, %cst_3 [1] : vector<16x128xf32> to vector<16xf32>
    %8 = vector.shape_cast %7 : vector<16xf32> to vector<16x1xf32>
    %9 = math.log %8 : vector<16x1xf32>
    %10 = vector.broadcast %9 : vector<16x1xf32> to vector<16x128xf32>
    %11 = arith.subf %5, %10 : vector<16x128xf32>
    %cst_4 = arith.constant dense<0xFF800000> : vector<16xf32>
    %12 = vector.multi_reduction <maximumf>, %1, %cst_4 [1] : vector<16x128xf32> to vector<16xf32>
    %13 = vector.shape_cast %12 : vector<16xf32> to vector<16x1xf32>
    %14 = vector.broadcast %13 : vector<16x1xf32> to vector<16x128xf32>
    %15 = arith.subf %1, %14 : vector<16x128xf32>
    %16 = math.exp %15 : vector<16x128xf32>
    %cst_5 = arith.constant dense<0.000000e+00> : vector<16xf32>
    %17 = vector.multi_reduction <add>, %16, %cst_5 [1] : vector<16x128xf32> to vector<16xf32>
    %18 = vector.shape_cast %17 : vector<16xf32> to vector<16x1xf32>
    %19 = tpu.reciprocal %18 : vector<16x1xf32> -> vector<16x1xf32>
    %20 = vector.broadcast %19 : vector<16x1xf32> to vector<16x128xf32>
    %21 = arith.mulf %16, %20 : vector<16x128xf32>
    %cst_6 = arith.constant 0.000000e+00 : f32
    %22 = vector.broadcast %cst_6 : f32 to vector<16x128xf32>
    %23 = arith.subf %22, %21 : vector<16x128xf32>
    %24 = arith.mulf %23, %11 : vector<16x128xf32>
    %c0_7 = arith.constant 0 : index
    %c0_8 = arith.constant 0 : index
    %25 = vector.load %arg3[%c0_7, %c0_8] : memref<16x128xf32, #tpu.memory_space<vmem>>, vector<16x128xf32>
    tpu.vector_store %arg3[%c0_7, %c0_8], %24 {strides = array<i32>} : memref<16x128xf32, #tpu.memory_space<vmem>>, vector<16x128xf32>,
    %c16_i32 = arith.constant 16 : i32
    %26 = arith.muli %arg0, %c16_i32 : i32
    %27 = tpu.iota {dimensions = array<i32: 0>} : vector<16x1xi32>
    %28 = vector.broadcast %26 : i32 to vector<16x1xi32>
    %29 = arith.addi %28, %27 : vector<16x1xi32>
    %cst_9 = arith.constant dense<0.000000e+00> : vector<16xf32>
    %30 = vector.multi_reduction <add>, %24, %cst_9 [1] : vector<16x128xf32> to vector<16xf32>
    %31 = vector.shape_cast %30 : vector<16xf32> to vector<16x1xf32>
    %c16_i32_10 = arith.constant 16 : i32
    %32 = vector.broadcast %c16_i32_10 : i32 to vector<16x1xi32>
    %33 = arith.cmpi slt, %29, %32 : vector<16x1xi32>
    %cst_11 = arith.constant 0.000000e+00 : f32
    %34 = vector.broadcast %cst_11 : f32 to vector<16x1xf32>
    %35 = arith.select %33, %31, %34 : vector<16x1xi1>, vector<16x1xf32>
    %36 = vector.shape_cast %35 : vector<16x1xf32> to vector<1x16x1xf32>
    %cst_12 = arith.constant dense<0.000000e+00> : vector<1xf32>
    %37 = vector.multi_reduction <add>, %36, %cst_12 [1, 2] : vector<1x16x1xf32> to vector<1xf32>
    %38 = vector.shape_cast %37 : vector<1xf32> to vector<1x1x1xf32>
    %39 = vector.extract %38[0, 0, 0] : f32 from vector<1x1x1xf32>
    %40 = vector.broadcast %39 : f32 to vector<1x8x128xf32>
    %c0_13 = arith.constant 0 : index
    %c0_14 = arith.constant 0 : index
    %c0_15 = arith.constant 0 : index
    %41 = vector.load %arg4[%c0_13, %c0_14, %c0_15] : memref<1x8x128xf32, #tpu.memory_space<vmem>>, vector<1x8x128xf32>
    tpu.vector_store %arg4[%c0_13, %c0_14, %c0_15], %40 {strides = array<i32>} : memref<1x8x128xf32, #tpu.memory_space<vmem>>, vector<1x8x128xf32>,
    return
  }
  func.func @transform_0(%arg0: i32) -> (i32, i32) {
    %c0_i32 = arith.constant 0 : i32
    %c0_i32_0 = arith.constant 0 : i32
    return %arg0, %c0_i32 : i32, i32
  }
  func.func @transform_1(%arg0: i32) -> (i32, i32) {
    %c0_i32 = arith.constant 0 : i32
    %c0_i32_0 = arith.constant 0 : i32
    return %arg0, %c0_i32 : i32, i32
  }
  func.func @transform_2(%arg0: i32) -> (i32, i32) {
    %c0_i32 = arith.constant 0 : i32
    %c0_i32_0 = arith.constant 0 : i32
    return %arg0, %c0_i32 : i32, i32
  }
  func.func @transform_3(%arg0: i32) -> (i32, i32, i32) {
    %c0_i32 = arith.constant 0 : i32
    %c0_i32_0 = arith.constant 0 : i32
    %c0_i32_1 = arith.constant 0 : i32
    return %arg0, %c0_i32, %c0_i32_0 : i32, i32, i32
  }
}

</mosaic_0001>

<bundles_post_ra>
// kernel: tpu_custom_call.1
= control target key start
LH: loop header
LB: loop body
LE: loop exit
PB: predicated region body
PF: predicated region fallthrough
CT: control target
= control target key end

     0   :  { %9 = vsyncpa [#allocation3], 0  ;;  %s356_s0 = inlined_call_operand.hbm [shape: f32[16,128], index: 0, kind: input, shape index: {}]   ;;  %s357_s1 = inlined_call_operand.hbm [shape: f32[16,128], index: 1, kind: input, shape index: {}]   ;;  %s358_s2 = inlined_call_operand.hbm [shape: f32[16,128], index: 2, kind: output, shape index: {0}]   ;;  %s359_s3 = inlined_call_operand.hbm [shape: f32[1,8,128], index: 3, kind: output, shape index: {1}]  }
   0x1   :  { %10 = vsyncpa [#allocation6], 0 }
   0x2   :  { %11 = vsyncpa [#allocation4], 0 }
   0x3   :  { %12 = vsyncpa [#allocation9], 0  ;;  %s273_s12 = smov [#allocation2]   ;;  %s177_s16 = scalar_lea.hbm %s356_s0, 256 }
   0x4   :  { %s18_s13 = sshll.u32 %s273_s12, 4  ;;  %p178_p0 = scmp.ne.s32.totalorder %s356_s0, %s177_s16  ;;  %s19_s13 = int_to_ptr.vmem [resolvable:$true] %s18_s13 }
   0x5   :  { %p181_p1 = scmp.lt.u32.totalorder %s177_s16, %s356_s0 }
   0x7   :  { %p183_p2 = pnand %p181_p1, %p178_p0 }
   0x9   :  { %186 = shalt.err (!%p183_p2)
}
   0xa   :  { %s187_s21 = scalar_lea.vmem %s19_s13, 256  ;;  %p192_p4 = scmp.lt.s32.totalorder %s19_s13, %s19_s13 }
   0xb   :  { %p188_p3 = scmp.ne.s32.totalorder %s19_s13, %s187_s21  ;;  %p193_p5 = scmp.lt.s32.totalorder %s187_s21, %s187_s21 }
   0xd   :  { %p194_p6 = por %p193_p5, %p192_p4 }
   0xf   :  { %p195_p7 = pnand %p194_p6, %p188_p3 }
  0x11   :  { %198 = shalt.err (!%p195_p7)
}
  0x12   :  { %s274_s22 = smov 128   ;;  %s275_s23 = smov 8  }
  0x13   :  { %24 = dma.hbm_to_vmem [thread:$0]  %s356_s0, 256, %s19_s13, [#allocation3], %s274_s22, %s274_s22, %s275_s23  }
  0x14   :  { %s276_s26 = smov [#allocation5]   ;;  %s199_s30 = scalar_lea.hbm %s357_s1, 256 }
  0x15   :  { %s30_s27 = sshll.u32 %s276_s26, 4  ;;  %p200_p8 = scmp.ne.s32.totalorder %s357_s1, %s199_s30  ;;  %s31_s27 = int_to_ptr.vmem [resolvable:$true] %s30_s27 }
  0x16   :  { %p203_p9 = scmp.lt.u32.totalorder %s199_s30, %s357_s1 }
  0x18   :  { %p205_p10 = pnand %p203_p9, %p200_p8 }
  0x1a   :  { %208 = shalt.err (!%p205_p10)
}
  0x1b   :  { %s209_s8 = scalar_lea.vmem %s31_s27, 256  ;;  %p214_p12 = scmp.lt.s32.totalorder %s31_s27, %s31_s27 }
  0x1c   :  { %p210_p11 = scmp.ne.s32.totalorder %s31_s27, %s209_s8  ;;  %p215_p13 = scmp.lt.s32.totalorder %s209_s8, %s209_s8 }
  0x1e   :  { %p216_p0 = por %p215_p13, %p214_p12 }
  0x20   :  { %p217_p1 = pnand %p216_p0, %p210_p11 }
  0x22   :  { %220 = shalt.err (!%p217_p1)
}
  0x23   :  { %36 = dma.hbm_to_vmem [thread:$0]  %s357_s1, 256, %s31_s27, [#allocation6], %s274_s22, %s274_s22, %s275_s23  }
  0x24   :  { %265 = dma.done.wait [#allocation3], 256  }
  0x25   :  { %266 = vsyncadd [#allocation3], 4294967040 }
  0x26   :  { %267 = dma.done.wait [#allocation6], 256  }
  0x27   :  { %268 = vsyncadd [#allocation6], 4294967040  ;;  %v43_v0 = vld [vmem:[#allocation2] sm:$0xff]  ;;  %v45_v1 = vld [vmem:[#allocation5] sm:$0xff]  ;;  %vm106_vm0 = vcmask 7168   ;;  %s277_s1 = smov [#allocation7]  }
  0x28   :  { %47 = vmax.xlane.f32.xlu0 %v43_v0  ;;  %67 = vmax.xlane.f32.xlu1 %v45_v1  ;;  %v44_v2 = vld [vmem:[#allocation2 + $0x8] sm:$0xff]  ;;  %v46_v3 = vld [vmem:[#allocation5 + $0x8] sm:$0xff]  ;;  %s126_s10 = sshll.u32 %s277_s1, 4  ;;  %s127_s10 = int_to_ptr.vmem [resolvable:$true] %s126_s10 }
  0x29   :  { %s221_s11 = scalar_lea.vmem %s127_s10, 256  ;;  %p226_p3 = scmp.lt.s32.totalorder %s127_s10, %s127_s10 }
  0x2a   :  { %p222_p2 = scmp.ne.s32.totalorder %s127_s10, %s221_s11  ;;  %p227_p4 = scmp.lt.s32.totalorder %s221_s11, %s221_s11 }
  0x2c   :  { %49 = vmax.xlane.f32.xlu0 %v44_v2  ;;  %69 = vmax.xlane.f32.xlu1 %v46_v3  ;;  %p228_p5 = por %p227_p4, %p226_p3 }
  0x2e   :  { %p229_p6 = pnand %p228_p5, %p222_p2 }
  0xb5   :  { %v48_v4 = vpop.xlane.xlu0 %47  ;;  %v68_v5 = vpop.xlane.xlu1 %67 }
  0xb6   :  { %v51_v6 = vsub.f32 %v43_v0, %v48_v4  ;;  %v71_v7 = vsub.f32 %v45_v1, %v68_v5 }
  0xb8   :  { %v53_v8 = vmul.f32 1.442695, %v51_v6  ;;  %v73_v9 = vmul.f32 1.442695, %v71_v7 }
  0xb9   :  { %v50_v10 = vpop.xlane.xlu0 %49  ;;  %v70_v11 = vpop.xlane.xlu1 %69 }
  0xba   :  { %161 = vpow2.f32 %v53_v8  ;;  %v52_v12 = vsub.f32 %v44_v2, %v50_v10  ;;  %v72_v13 = vsub.f32 %v46_v3, %v70_v11 }
  0xbb   :  { %163 = vpow2.f32 %v73_v9 }
  0xbc   :  { %v55_v14 = vmul.f32 1.442695, %v52_v12  ;;  %v75_v15 = vmul.f32 1.442695, %v72_v13 }
  0xbe   :  { %165 = vpow2.f32 %v55_v14 }
  0xbf   :  { %167 = vpow2.f32 %v75_v15 }
  0xc4   :  { %v162_v16 = vpop.eup %161 }
  0xc5   :  { %57 = vadd.xlane.f32.xlu0 %v162_v16  ;;  %v164_v17 = vpop.eup %163 }
  0xc8   :  { %v166_v18 = vpop.eup %165 }
  0xc9   :  { %77 = vadd.xlane.f32.xlu0 %v164_v17  ;;  %59 = vadd.xlane.f32.xlu1 %v166_v18  ;;  %v168_v19 = vpop.eup %167 }
  0xcd   :  { %79 = vadd.xlane.f32.xlu1 %v168_v19 }
 0x152   :  { %v58_v20 = vpop.xlane.xlu0 %57 }
 0x153   :  { %169 = vlog2.f32 %v58_v20 }
 0x156   :  { %v60_v21 = vpop.xlane.xlu1 %59  ;;  %v78_v22 = vpop.xlane.xlu0 %77 }
 0x157   :  { %171 = vlog2.f32 %v60_v21 }
 0x158   :  { %173 = vrcp.f32 %v78_v22 }
 0x15a   :  { %v80_v23 = vpop.xlane.xlu1 %79 }
 0x15b   :  { %175 = vrcp.f32 %v80_v23 }
 0x15d   :  { %v170_v24 = vpop.eup %169 }
 0x15e   :  { %v62_v26 = vmul.f32 0.6931472, %v170_v24 }
 0x160   :  { %v65_v31 = vsub.f32 %v51_v6, %v62_v26 }
 0x161   :  { %v172_v25 = vpop.eup %171 }
 0x162   :  { %v174_v27 = vpop.eup %173  ;;  %v64_v29 = vmul.f32 0.6931472, %v172_v25 }
 0x163   :  { %v83_v28 = vmul.f32 %v174_v27, %v164_v17 }
 0x164   :  { %v66_v35 = vsub.f32 %v52_v12, %v64_v29 }
 0x165   :  { %v176_v30 = vpop.eup %175  ;;  %v85_v32 = vsub.f32 0.0, %v83_v28 }
 0x166   :  { %v84_v33 = vmul.f32 %v176_v30, %v168_v19 }
 0x167   :  { %v87_v34 = vmul.f32 %v85_v32, %v65_v31 }
 0x168   :  { %v86_v36 = vsub.f32 0.0, %v84_v33 }
 0x169   :  { %98 = vadd.xlane.f32.xlu0 %v87_v34  ;;  %89 = vst [vmem:[#allocation7] sm:$0xff] %v87_v34 }
 0x16a   :  { %v88_v37 = vmul.f32 %v86_v36, %v66_v35 }
 0x16c   :  { %100 = vadd.xlane.f32.xlu1 %v88_v37  ;;  %90 = vst [vmem:[#allocation7 + $0x8] sm:$0xff] %v88_v37 }
 0x1f6   :  { %v99_v38 = vpop.xlane.xlu0 %98 }
 0x1f7   :  { %v107_v40 = vsel %vm106_vm0, %v99_v38, 0.0 }
 0x1f9   :  { %v101_v39 = vpop.xlane.xlu1 %100 }
 0x1fa   :  { %v108_v41 = vsel %vm106_vm0, %v101_v39, 0.0 }
 0x1fb   :  { %v109_v42 = vadd.f32 %v108_v41, %v107_v40 }
 0x1fd   :  { %110 = vadd.xlane.f32.xlu0 %v109_v42 }
 0x1fe   :  { %232 = shalt.err (!%p229_p6)
}
 0x1ff   :  { %s233_s14 = scalar_lea.hbm %s358_s2, 256 }
 0x200   :  { %p234_p7 = scmp.ne.s32.totalorder %s358_s2, %s233_s14  ;;  %p237_p8 = scmp.lt.u32.totalorder %s233_s14, %s358_s2 }
 0x202   :  { %p239_p9 = pnand %p237_p8, %p234_p7 }
 0x204   :  { %242 = shalt.err (!%p239_p9)
}
 0x205   :  { %132 = dma.vmem_to_hbm [thread:$0]  %s127_s10, 256, %s358_s2, [#allocation4], %s274_s22, %s274_s22, %s275_s23  }
 0x206   :  { %s278_s21 = smov [#allocation8]  }
 0x207   :  { %s139_s24 = sshll.u32 %s278_s21, 4  ;;  %s140_s24 = int_to_ptr.vmem [resolvable:$true] %s139_s24 }
 0x208   :  { %s243_s26 = scalar_lea.vmem %s140_s24, 128  ;;  %p248_p11 = scmp.lt.s32.totalorder %s140_s24, %s140_s24 }
 0x209   :  { %p244_p10 = scmp.ne.s32.totalorder %s140_s24, %s243_s26  ;;  %p249_p12 = scmp.lt.s32.totalorder %s243_s26, %s243_s26 }
 0x20b   :  { %p250_p13 = por %p249_p12, %p248_p11 }
 0x20d   :  { %p251_p0 = pnand %p250_p13, %p244_p10 }
 0x28a   :  { %v111_v43 = vpop.xlane.xlu0 %110 }
 0x28b   :  { %v112_v44 = vrot.slane %v111_v43, 4 }
 0x28d   :  { %v113_v45 = vadd.f32 %v112_v44, %v111_v43 }
 0x28f   :  { %v114_v46 = vrot.slane %v113_v45, 2 }
 0x291   :  { %v115_v47 = vadd.f32 %v114_v46, %v113_v45 }
 0x293   :  { %v116_v48 = vrot.slane %v115_v47, 1 }
 0x295   :  { %v117_v49 = vadd.f32 %v116_v48, %v115_v47 }
 0x297   :  { %153 = vpush %v117_v49 }
 0x2c8   :  { %s154_s25 = spop %153 }
 0x2c9   :  { %v119_v50 = vstv %s154_s25 }
 0x2ca   :  { %120 = vst [vmem:[#allocation8] sm:$0xff] %v119_v50 }
 0x2cb   :  { %254 = shalt.err (!%p251_p0)
}
 0x2cc   :  { %s255_s23 = scalar_lea.hbm %s359_s3, 128 }
 0x2cd   :  { %p256_p1 = scmp.ne.s32.totalorder %s359_s3, %s255_s23  ;;  %p259_p2 = scmp.lt.u32.totalorder %s255_s23, %s359_s3 }
 0x2cf   :  { %p261_p3 = pnand %p259_p2, %p256_p1 }
 0x2d1   :  { %264 = shalt.err (!%p261_p3)
}
 0x2d2   :  { %142 = dma.vmem_to_hbm [thread:$0]  %s140_s24, 128, %s359_s3, [#allocation9]  }
 0x2d3   :  { %269 = dma.done.wait [#allocation4], 256  }
 0x2d4   :  { %270 = vsyncadd [#allocation4], 4294967040 }
 0x2d5   :  { %271 = dma.done.wait [#allocation9], 128  }
 0x2d6   :  { %272 = vsyncadd [#allocation9], 4294967168 }
 0x2d7   :  { %149 = vsyncpa [#allocation3], 1 }
 0x2d8   :  { %150 = vsyncpa [#allocation6], 1 }
 0x2d9   :  { %151 = vsyncpa [#allocation4], 1 }
 0x2da   :  { %152 = vsyncpa [#allocation9], 1 }

</bundles_post_ra>
